<compile_context>
chip_gen: v7x
topology: tpu7x:2x2x1
jax: 0.10.0
libtpu: 0.0.40
codegen_flags: <defaults>
</compile_context>

<pallas_src>
import jax
import jax.numpy as jnp
from jax.experimental import pallas as pl
from jax.experimental.pallas import tpu as pltpu


def _make_loss_weighting_kernel(num_tasks: int):
    def kernel(w_ref, l_ref, out_ref):
        # w_ref: (1, N) learnable logits (VMEM); l_ref: (1, N) per-task losses
        # (VMEM); out_ref: (1, 1) SMEM scalar output.
        w = w_ref[...].astype(jnp.float32)        # (1, N)
        losses = l_ref[...].astype(jnp.float32)   # (1, N)

        # Numerically-stabilized softmax numerator over the lane (task) axis.
        m = jnp.max(w, axis=-1, keepdims=True)    # (1, 1)
        e = jnp.exp(w - m)                        # (1, N)

        # Fold the normalization into a scalar epilogue:
        #   softmax(w) * N . losses == (sum(e * losses) / sum(e)) * N
        s = jnp.sum(e, axis=-1, keepdims=True)            # (1, 1)
        t = jnp.sum(e * losses, axis=-1, keepdims=True)   # (1, 1)
        res = t * pl.reciprocal(s, approx=True) * jnp.float32(num_tasks)
        out_ref[0, 0] = res[0, 0]

    return kernel


def learnable_loss_weighting(weights: jax.Array, losses_vec: jax.Array) -> jax.Array:
    """weights: (N,) learnable param; losses_vec: (N,) per-task scalar losses.

    Returns a (1, 1) float32 array holding the total weighted loss (squeeze in
    the caller's jitted graph if a 0-d scalar is needed).
    """
    assert weights.shape == losses_vec.shape and weights.ndim == 1
    n = weights.shape[0]

    out = pl.pallas_call(
        _make_loss_weighting_kernel(n),
        out_shape=jax.ShapeDtypeStruct((1, 1), jnp.float32),
        in_specs=[
            pl.BlockSpec(memory_space=pltpu.MemorySpace.VMEM),
            pl.BlockSpec(memory_space=pltpu.MemorySpace.VMEM),
        ],
        out_specs=pl.BlockSpec(memory_space=pltpu.MemorySpace.SMEM),
        cost_estimate=pl.CostEstimate(
            flops=3 * n, transcendentals=n, bytes_accessed=8 * n + 4
        ),
    )(weights.reshape(1, n), losses_vec.reshape(1, n))

    return out  # (1, 1)


def reference(weights, losses_vec):
    w = jax.nn.softmax(weights.astype(jnp.float32)) * weights.shape[0]
    return jnp.sum(w * losses_vec.astype(jnp.float32))


if __name__ == "__main__":
    task_names = ["mlm", "nsp", "clf", "reg"]
    num_tasks = len(task_names)

    # Deterministic parameter init: nn.Parameter(torch.ones(len(task_names)))
    weights = jnp.ones((num_tasks,), dtype=jnp.float32)

    # Deterministic synthetic per-task scalar losses (the "losses" dict values).
    key = jax.random.PRNGKey(0)
    loss_values = jax.random.uniform(key, (num_tasks,), dtype=jnp.float32) * 2.0
    losses = {name: loss_values[i] for i, name in enumerate(task_names)}

    # Glue: stack dict of scalar losses into a vector in task (insertion) order.
    losses_vec = jnp.stack([losses[name] for name in task_names])

    total_2d = learnable_loss_weighting(weights, losses_vec)
    total_2d = jax.block_until_ready(total_2d)

    expected = reference(weights, losses_vec)
    # approx=True reciprocal -> loosen tolerance to 1e-4.
    assert jnp.allclose(total_2d.reshape(()), expected, rtol=1e-4, atol=1e-4), (
        total_2d, expected)

    print("KERNEL_OK")
</pallas_src>

<mosaic_0001>
module attributes {stable_mosaic.version = 11 : i64} {
  func.func @kernel(%arg0: memref<1x4xf32, #tpu.memory_space<vmem>>, %arg1: memref<1x4xf32, #tpu.memory_space<vmem>>, %arg2: memref<1x1xf32, #tpu.memory_space<smem>>) attributes {dimension_semantics = [], scalar_prefetch = 0 : i64, scratch_operands = 0 : i64, tpu.core_type = #tpu.core_type<tc>} {
    %c0 = arith.constant 0 : index
    %c0_0 = arith.constant 0 : index
    %0 = vector.load %arg0[%c0, %c0_0] : memref<1x4xf32, #tpu.memory_space<vmem>>, vector<1x4xf32>
    %c0_1 = arith.constant 0 : index
    %c0_2 = arith.constant 0 : index
    %1 = vector.load %arg1[%c0_1, %c0_2] : memref<1x4xf32, #tpu.memory_space<vmem>>, vector<1x4xf32>
    %cst = arith.constant dense<0xFF800000> : vector<1xf32>
    %2 = vector.multi_reduction <maximumf>, %0, %cst [1] : vector<1x4xf32> to vector<1xf32>
    %3 = vector.shape_cast %2 : vector<1xf32> to vector<1x1xf32>
    %4 = vector.broadcast %3 : vector<1x1xf32> to vector<1x4xf32>
    %5 = arith.subf %0, %4 : vector<1x4xf32>
    %6 = math.exp %5 : vector<1x4xf32>
    %cst_3 = arith.constant dense<0.000000e+00> : vector<1xf32>
    %7 = vector.multi_reduction <add>, %6, %cst_3 [1] : vector<1x4xf32> to vector<1xf32>
    %8 = vector.shape_cast %7 : vector<1xf32> to vector<1x1xf32>
    %9 = arith.mulf %6, %1 : vector<1x4xf32>
    %cst_4 = arith.constant dense<0.000000e+00> : vector<1xf32>
    %10 = vector.multi_reduction <add>, %9, %cst_4 [1] : vector<1x4xf32> to vector<1xf32>
    %11 = vector.shape_cast %10 : vector<1xf32> to vector<1x1xf32>
    %12 = tpu.reciprocal %8 {approx = true} : vector<1x1xf32> -> vector<1x1xf32>
    %13 = arith.mulf %11, %12 : vector<1x1xf32>
    %cst_5 = arith.constant 4.000000e+00 : f32
    %14 = vector.broadcast %cst_5 : f32 to vector<1x1xf32>
    %15 = arith.mulf %13, %14 : vector<1x1xf32>
    %16 = vector.extract %15[0, 0] : f32 from vector<1x1xf32>
    %c0_6 = arith.constant 0 : index
    %c0_7 = arith.constant 0 : index
    %17 = memref.load %arg2[%c0_6, %c0_7] : memref<1x1xf32, #tpu.memory_space<smem>>
    memref.store %16, %arg2[%c0_6, %c0_7] : memref<1x1xf32, #tpu.memory_space<smem>>
    return
  }
}

</mosaic_0001>

<bundles_post_ra>
// kernel: tpu_custom_call.1
= control target key start
LH: loop header
LB: loop body
LE: loop exit
PB: predicated region body
PF: predicated region fallthrough
CT: control target
= control target key end

     0   :  { %7 = vsyncpa [#allocation3], 0  ;;  %s148_s0 = inlined_call_operand.hbm [shape: f32[1,4], index: 0, kind: input, shape index: {}]   ;;  %s149_s1 = inlined_call_operand.vmem [shape: f32[1,4], index: 1, kind: input, shape index: {}]   ;;  %s150_s2 = inlined_call_operand.hbm [shape: f32[1,1], index: 2, kind: output, shape index: {}]  }
   0x1   :  { %8 = vsyncpa [#allocation4], 0  ;;  %s104_s9 = smov [#allocation2]   ;;  %s68_s13 = scalar_lea.hbm %s148_s0, 16 }
   0x2   :  { %s15_s10 = sshll.u32 %s104_s9, 4  ;;  %p69_p0 = scmp.ne.s32.totalorder %s148_s0, %s68_s13  ;;  %s16_s10 = int_to_ptr.vmem [resolvable:$true] %s15_s10 }
   0x3   :  { %p72_p1 = scmp.lt.u32.totalorder %s68_s13, %s148_s0 }
   0x5   :  { %p74_p2 = pnand %p72_p1, %p69_p0 }
   0x7   :  { %77 = shalt.err (!%p74_p2)
}
   0x8   :  { %s78_s18 = scalar_lea.vmem %s16_s10, 16  ;;  %s82_s19 = scalar_lea.vmem %s16_s10, 32 }
   0x9   :  { %p79_p3 = scmp.ne.s32.totalorder %s16_s10, %s78_s18  ;;  %p83_p4 = scmp.lt.s32.totalorder %s16_s10, %s16_s10 }
   0xa   :  { %p84_p5 = scmp.lt.s32.totalorder %s82_s19, %s78_s18 }
   0xc   :  { %p85_p6 = por %p84_p5, %p83_p4 }
   0xe   :  { %p86_p7 = pnand %p85_p6, %p79_p3 }
  0x10   :  { %89 = shalt.err (!%p86_p7)
}
  0x11   :  { %18 = dma.hbm_to_vmem [thread:$0]  %s148_s0, 16, %s16_s10, [#allocation3]  }
  0x12   :  { %100 = dma.done.wait [#allocation3], 16  }
  0x13   :  { %101 = vsyncadd [#allocation3], 4294967280  ;;  %vm26_vm0 = vcmask 24576   ;;  %v24_v0 = vld [vmem:[#allocation2] sm:$0x1]  ;;  %s90_s26 = scalar_lea.hbm %s150_s2, 16 }
  0x14   :  { %v27_v1 = vsel %vm26_vm0, %v24_v0, -inf  ;;  %v25_v5 = vld [vmem:[%s149_s1] sm:$0x1]  ;;  %p91_p8 = scmp.ne.s32.totalorder %s150_s2, %s90_s26  ;;  %p94_p9 = scmp.lt.u32.totalorder %s90_s26, %s150_s2 }
  0x15   :  { %28 = vmax.xlane.f32.xlu0 %v27_v1 }
  0x16   :  { %p96_p10 = pnand %p94_p9, %p91_p8 }
  0xa2   :  { %v29_v2 = vpop.xlane.xlu0 %28 }
  0xa3   :  { %v30_v3 = vsub.f32 %v24_v0, %v29_v2 }
  0xa5   :  { %v31_v4 = vmul.f32 1.442695, %v30_v3 }
  0xa7   :  { %64 = vpow2.f32 %v31_v4 }
  0xb1   :  { %v65_v6 = vpop.eup %64 }
  0xb2   :  { %v33_v7 = vsel %vm26_vm0, %v65_v6, 0.0  ;;  %v36_v8 = vmul.f32 %v65_v6, %v25_v5 }
  0xb3   :  { %34 = vadd.xlane.f32.xlu0 %v33_v7 }
  0xb4   :  { %v37_v9 = vsel %vm26_vm0, %v36_v8, 0.0 }
  0xb5   :  { %38 = vadd.xlane.f32.xlu1 %v37_v9 }
 0x140   :  { %v35_v10 = vpop.xlane.xlu0 %34 }
 0x141   :  { %66 = vrcp.f32 %v35_v10 }
 0x142   :  { %v39_v12 = vpop.xlane.xlu1 %38 }
 0x14b   :  { %v67_v11 = vpop.eup %66 }
 0x14c   :  { %v41_v13 = vmul.f32 %v67_v11, %v39_v12 }
 0x14e   :  { %v42_v14 = vmul.f32 4.0, %v41_v13 }
 0x150   :  { %60 = vpush %v42_v14 }
 0x181   :  { %s61_s0 = spop %60 }
 0x182   :  { %45 = sst [smem:[#allocation5]] %s61_s0 }
 0x183   :  { %99 = shalt.err (!%p96_p10)
}
 0x184   :  { %s105_s30 = smov [#allocation5]  }
 0x185   :  { %53 = dma.smem_to_hbm %s105_s30, 16, %s150_s2, [#allocation4]  }
 0x186   :  { %102 = dma.done.wait [#allocation4], 16  }
 0x187   :  { %103 = vsyncadd [#allocation4], 4294967280 }
 0x188   :  { %57 = sfence }
 0x189   :  { %58 = vsyncpa [#allocation3], 1 }
 0x18a   :  { %59 = vsyncpa [#allocation4], 1 }

</bundles_post_ra>
